<compile_context>
chip_gen: v7x
topology: tpu7x:2x2x1
jax: 0.10.0
libtpu: 0.0.40
codegen_flags: <defaults>
</compile_context>

<pallas_src>
import functools

import jax
import jax.numpy as jnp
from jax.experimental import pallas as pl
from jax.experimental.pallas import tpu as pltpu

_EPS = 1e-8                            # F.cosine_similarity default eps
_TARGET_BLOCK_BYTES = 4 * 1024 * 1024  # per input, per pipeline buffer
_MAX_TB = 4096                         # row cap (keeps scratch/temporaries small)


def _round_up(x, m):
    return (x + m - 1) // m * m


@functools.lru_cache(maxsize=None)
def _tpu_config():
    """Returns (parallel_cores, explicit_vmem_budget_bytes, vmem_limit_bytes)."""
    vmem_cap = None
    try:
        vmem_cap = int(pltpu.get_tpu_info().vmem_capacity_bytes)
    except Exception:
        pass
    kind = ""
    try:
        kind = jax.devices()[0].device_kind.lower()
    except Exception:
        pass

    v7_like = ("v7" in kind or "7x" in kind
               or (vmem_cap is not None and vmem_cap <= 96 * 1024 * 1024))
    if v7_like:
        # 64 MiB VMEM per TC, 2 TensorCores: keep explicit buffers <= ~40 MiB
        # and leave headroom for Mosaic internal scratch.
        return 2, 40 * 1024 * 1024, 56 * 1024 * 1024
    if ("lite" in kind) or ("v5e" in kind) or ("v6" in kind):
        # Single TensorCore, 128 MiB physical VMEM.
        return 1, 64 * 1024 * 1024, 96 * 1024 * 1024
    # Unknown / other generations: conservative but still explicit.
    return 1, 24 * 1024 * 1024, 48 * 1024 * 1024


def _triplet_loss_kernel(a_ref, p_ref, n_ref, o_ref, acc_ref, *,
                         margin, batch, tb, tiles_per_core):
    c = pl.program_id(0)          # core / batch-half index  ("parallel")
    i = pl.program_id(1)          # tile index within a half ("arbitrary")

    @pl.when(i == 0)
    def _init():
        acc_ref[...] = jnp.zeros_like(acc_ref)

    a = a_ref[...].astype(jnp.float32)   # no-op for f32; per-vreg upcast for bf16
    p = p_ref[...].astype(jnp.float32)
    n = n_ref[...].astype(jnp.float32)

    eps2 = _EPS * _EPS
    # rsqrt goes to the (otherwise idle) EUP slot; clamping the squared norm to
    # eps^2 preserves PyTorch cosine_similarity's norm >= eps behavior.
    inv_a = jax.lax.rsqrt(jnp.maximum(jnp.sum(a * a, axis=1, keepdims=True), eps2))
    inv_p = jax.lax.rsqrt(jnp.maximum(jnp.sum(p * p, axis=1, keepdims=True), eps2))
    inv_n = jax.lax.rsqrt(jnp.maximum(jnp.sum(n * n, axis=1, keepdims=True), eps2))

    pos_sim = jnp.sum(a * p, axis=1, keepdims=True) * (inv_a * inv_p)
    neg_sim = jnp.sum(a * n, axis=1, keepdims=True) * (inv_a * inv_n)

    # margin + (1 - pos_sim) - (1 - neg_sim) == margin + neg_sim - pos_sim
    hinge = jnp.maximum(margin + neg_sim - pos_sim, 0.0)          # (tb, 1)

    row0 = (c * tiles_per_core + i) * tb                          # logical rows

    # Fully-valid tiles: plain accumulate, no iota/compare/select.
    @pl.when(row0 + tb <= batch)
    def _full_tile():
        acc_ref[...] += hinge

    # Tail / overhang tiles (unpadded inputs): mask invalid logical rows to 0.
    # jnp.where does not propagate NaN/Inf from the masked (garbage) lanes.
    @pl.when(row0 + tb > batch)
    def _tail_tile():
        rows = row0 + jax.lax.broadcasted_iota(jnp.int32, (tb, 1), 0)
        acc_ref[...] += jnp.where(rows < batch, hinge, 0.0)

    @pl.when(i == tiles_per_core - 1)
    def _finalize():
        # Single cross-sublane reduction, broadcast into this core's lane-
        # aligned (8, 128) output slab.
        part = jnp.sum(acc_ref[...], axis=0, keepdims=True)       # (1, 1)
        o_ref[...] = jnp.broadcast_to(part, o_ref.shape)


def triplet_loss(anchor, positive, negative, margin, *, tb=None):
    """Scalar loss; same semantics as TripletLoss(margin).forward(a, p, n)."""
    assert anchor.shape == positive.shape == negative.shape
    assert anchor.ndim == 2
    B, D = anchor.shape
    itemsize = anchor.dtype.itemsize

    ncores, vmem_budget, vmem_limit = _tpu_config()
    ncores = min(ncores, max(1, pl.cdiv(B, 8)))   # don't split tiny batches

    # ---- tile sizing: bytes-per-block target, bounded by the VMEM budget ----
    rows_per_core = pl.cdiv(B, ncores)
    if tb is None:
        target_rows = _round_up(pl.cdiv(_TARGET_BLOCK_BYTES, D * itemsize), 8)
        budget_rows = max(8, (vmem_budget // (3 * 2 * D * itemsize)) // 8 * 8)
        tb = min(target_rows, budget_rows, _MAX_TB, _round_up(rows_per_core, 8))
    tb = max(8, _round_up(tb, 8))
    tiles_per_core = pl.cdiv(rows_per_core, tb)

    # Last block index that still contains a valid row.  Blocks past it (can
    # only happen when the 2-way core split overshoots B) are clamped here so
    # no DMA ever targets a fully out-of-bounds window; their logical rows are
    # all >= B and get masked to zero in the kernel.
    last_block = pl.cdiv(B, tb) - 1

    def in_index_map(c, i):
        return (jnp.minimum(c * tiles_per_core + i, last_block), 0)

    in_spec = pl.BlockSpec((tb, D), in_index_map)

    kernel = functools.partial(
        _triplet_loss_kernel,
        margin=float(margin), batch=B, tb=tb, tiles_per_core=tiles_per_core)

    cost = pl.CostEstimate(
        flops=int(10 * B * D),
        transcendentals=int(3 * B),
        bytes_accessed=int(3 * B * D * itemsize))

    out = pl.pallas_call(
        kernel,
        out_shape=jax.ShapeDtypeStruct((ncores * 8, 128), jnp.float32),
        grid_spec=pltpu.PrefetchScalarGridSpec(
            num_scalar_prefetch=0,
            grid=(ncores, tiles_per_core),
            in_specs=[in_spec, in_spec, in_spec],
            out_specs=pl.BlockSpec((8, 128), lambda c, i: (c, 0)),
            scratch_shapes=[pltpu.VMEM((tb, 1), jnp.float32)],
        ),
        compiler_params=pltpu.CompilerParams(
            dimension_semantics=("parallel", "arbitrary"),
            vmem_limit_bytes=vmem_limit,
        ),
        cost_estimate=cost,
    )(anchor, positive, negative)

    partial_sums = out[::8, 0]                   # one partial sum per core slab
    return jnp.sum(partial_sums) / B


def _reference(anchor, positive, negative, margin):
    # Pure-JAX reference matching F.cosine_similarity-based triplet loss.
    def cos(x, y):
        xn = jnp.maximum(jnp.linalg.norm(x, axis=1), _EPS)
        yn = jnp.maximum(jnp.linalg.norm(y, axis=1), _EPS)
        return jnp.sum(x * y, axis=1) / (xn * yn)

    pos_dist = 1.0 - cos(anchor, positive)
    neg_dist = 1.0 - cos(anchor, negative)
    return jnp.mean(jnp.maximum(margin + pos_dist - neg_dist, 0.0))


if __name__ == "__main__":
    key = jax.random.PRNGKey(0)
    margin = 0.5

    # Case 1: B not a multiple of the tile -> single masked (partial) tile.
    # Case 2: forced tiny tile -> multi-tile accumulation, all tiles full.
    # Case 3: forced tiny tile with ragged B -> full tiles + masked tail tile.
    cases = [(12, 128, None), (40, 256, 8), (13, 128, 8)]
    for case_i, (B, D, forced_tb) in enumerate(cases):
        k1, k2, k3 = jax.random.split(jax.random.fold_in(key, case_i), 3)
        anchor = jax.random.normal(k1, (B, D), dtype=jnp.float32)
        positive = jax.random.normal(k2, (B, D), dtype=jnp.float32)
        negative = jax.random.normal(k3, (B, D), dtype=jnp.float32)

        loss = triplet_loss(anchor, positive, negative, margin, tb=forced_tb)
        loss = jax.block_until_ready(loss)

        ref = _reference(anchor, positive, negative, margin)
        assert jnp.allclose(loss, ref, atol=1e-5, rtol=1e-5), (case_i, loss, ref)

    print("KERNEL_OK")
</pallas_src>

<mosaic_0001>
module attributes {stable_mosaic.version = 11 : i64} {
  func.func @_triplet_loss_kernel(%arg0: i32, %arg1: i32, %arg2: memref<16x128xf32, #tpu.memory_space<vmem>>, %arg3: memref<16x128xf32, #tpu.memory_space<vmem>>, %arg4: memref<16x128xf32, #tpu.memory_space<vmem>>, %arg5: memref<8x128xf32, #tpu.memory_space<vmem>>, %arg6: memref<16x1xf32, #tpu.memory_space<vmem>>) attributes {dimension_semantics = [#tpu.dimension_semantics<parallel>, #tpu.dimension_semantics<arbitrary>], iteration_bounds = array<i64: 1, 1>, scalar_prefetch = 0 : i64, scratch_operands = 1 : i64, tpu.core_type = #tpu.core_type<tc>, window_params = [{transform_indices = @transform_0, window_bounds = array<i64: 16, 128>}, {transform_indices = @transform_1, window_bounds = array<i64: 16, 128>}, {transform_indices = @transform_2, window_bounds = array<i64: 16, 128>}, {transform_indices = @transform_3, window_bounds = array<i64: 8, 128>}]} {
    %c0_i32 = arith.constant 0 : i32
    %0 = arith.cmpi eq, %arg1, %c0_i32 : i32
    %1 = arith.extui %0 : i1 to i32
    %c0_i32_0 = arith.constant 0 : i32
    %2 = arith.cmpi ne, %1, %c0_i32_0 : i32
    scf.if %2 {
      %cst_22 = arith.constant 0.000000e+00 : f32
      %53 = vector.broadcast %cst_22 : f32 to vector<16x1xf32>
      %c0_23 = arith.constant 0 : index
      %c0_24 = arith.constant 0 : index
      %54 = vector.load %arg6[%c0_23, %c0_24] : memref<16x1xf32, #tpu.memory_space<vmem>>, vector<16x1xf32>
      tpu.vector_store %arg6[%c0_23, %c0_24], %53 {strides = array<i32>} : memref<16x1xf32, #tpu.memory_space<vmem>>, vector<16x1xf32>,
    } else {
    }
    %c0 = arith.constant 0 : index
    %c0_1 = arith.constant 0 : index
    %3 = vector.load %arg2[%c0, %c0_1] : memref<16x128xf32, #tpu.memory_space<vmem>>, vector<16x128xf32>
    %c0_2 = arith.constant 0 : index
    %c0_3 = arith.constant 0 : index
    %4 = vector.load %arg3[%c0_2, %c0_3] : memref<16x128xf32, #tpu.memory_space<vmem>>, vector<16x128xf32>
    %c0_4 = arith.constant 0 : index
    %c0_5 = arith.constant 0 : index
    %5 = vector.load %arg4[%c0_4, %c0_5] : memref<16x128xf32, #tpu.memory_space<vmem>>, vector<16x128xf32>
    %6 = arith.mulf %3, %3 : vector<16x128xf32>
    %cst = arith.constant dense<0.000000e+00> : vector<16xf32>
    %7 = vector.multi_reduction <add>, %6, %cst [1] : vector<16x128xf32> to vector<16xf32>
    %8 = vector.shape_cast %7 : vector<16xf32> to vector<16x1xf32>
    %cst_6 = arith.constant 1.000000e-16 : f32
    %9 = vector.broadcast %cst_6 : f32 to vector<16x1xf32>
    %10 = arith.maximumf %8, %9 : vector<16x1xf32>
    %11 = math.rsqrt %10 : vector<16x1xf32>
    %12 = arith.mulf %4, %4 : vector<16x128xf32>
    %cst_7 = arith.constant dense<0.000000e+00> : vector<16xf32>
    %13 = vector.multi_reduction <add>, %12, %cst_7 [1] : vector<16x128xf32> to vector<16xf32>
    %14 = vector.shape_cast %13 : vector<16xf32> to vector<16x1xf32>
    %cst_8 = arith.constant 1.000000e-16 : f32
    %15 = vector.broadcast %cst_8 : f32 to vector<16x1xf32>
    %16 = arith.maximumf %14, %15 : vector<16x1xf32>
    %17 = math.rsqrt %16 : vector<16x1xf32>
    %18 = arith.mulf %5, %5 : vector<16x128xf32>
    %cst_9 = arith.constant dense<0.000000e+00> : vector<16xf32>
    %19 = vector.multi_reduction <add>, %18, %cst_9 [1] : vector<16x128xf32> to vector<16xf32>
    %20 = vector.shape_cast %19 : vector<16xf32> to vector<16x1xf32>
    %cst_10 = arith.constant 1.000000e-16 : f32
    %21 = vector.broadcast %cst_10 : f32 to vector<16x1xf32>
    %22 = arith.maximumf %20, %21 : vector<16x1xf32>
    %23 = math.rsqrt %22 : vector<16x1xf32>
    %24 = arith.mulf %3, %4 : vector<16x128xf32>
    %cst_11 = arith.constant dense<0.000000e+00> : vector<16xf32>
    %25 = vector.multi_reduction <add>, %24, %cst_11 [1] : vector<16x128xf32> to vector<16xf32>
    %26 = vector.shape_cast %25 : vector<16xf32> to vector<16x1xf32>
    %27 = arith.mulf %11, %17 : vector<16x1xf32>
    %28 = arith.mulf %26, %27 : vector<16x1xf32>
    %29 = arith.mulf %3, %5 : vector<16x128xf32>
    %cst_12 = arith.constant dense<0.000000e+00> : vector<16xf32>
    %30 = vector.multi_reduction <add>, %29, %cst_12 [1] : vector<16x128xf32> to vector<16xf32>
    %31 = vector.shape_cast %30 : vector<16xf32> to vector<16x1xf32>
    %32 = arith.mulf %11, %23 : vector<16x1xf32>
    %33 = arith.mulf %31, %32 : vector<16x1xf32>
    %cst_13 = arith.constant 5.000000e-01 : f32
    %34 = vector.broadcast %cst_13 : f32 to vector<16x1xf32>
    %35 = arith.addf %34, %33 : vector<16x1xf32>
    %36 = arith.subf %35, %28 : vector<16x1xf32>
    %cst_14 = arith.constant 0.000000e+00 : f32
    %37 = vector.broadcast %cst_14 : f32 to vector<16x1xf32>
    %38 = arith.maximumf %36, %37 : vector<16x1xf32>
    %c1_i32 = arith.constant 1 : i32
    %39 = arith.muli %arg0, %c1_i32 : i32
    %40 = arith.addi %39, %arg1 : i32
    %c16_i32 = arith.constant 16 : i32
    %41 = arith.muli %40, %c16_i32 : i32
    %c16_i32_15 = arith.constant 16 : i32
    %42 = arith.addi %41, %c16_i32_15 : i32
    %c12_i32 = arith.constant 12 : i32
    %43 = arith.cmpi sle, %42, %c12_i32 : i32
    %44 = arith.extui %43 : i1 to i32
    %c0_i32_16 = arith.constant 0 : i32
    %45 = arith.cmpi ne, %44, %c0_i32_16 : i32
    scf.if %45 {
      %c0_22 = arith.constant 0 : index
      %c0_23 = arith.constant 0 : index
      %53 = vector.load %arg6[%c0_22, %c0_23] : memref<16x1xf32, #tpu.memory_space<vmem>>, vector<16x1xf32>
      %54 = arith.addf %53, %38 : vector<16x1xf32>
      %c0_24 = arith.constant 0 : index
      %c0_25 = arith.constant 0 : index
      %55 = vector.load %arg6[%c0_24, %c0_25] : memref<16x1xf32, #tpu.memory_space<vmem>>, vector<16x1xf32>
      tpu.vector_store %arg6[%c0_24, %c0_25], %54 {strides = array<i32>} : memref<16x1xf32, #tpu.memory_space<vmem>>, vector<16x1xf32>,
    } else {
    }
    %c16_i32_17 = arith.constant 16 : i32
    %46 = arith.addi %41, %c16_i32_17 : i32
    %c12_i32_18 = arith.constant 12 : i32
    %47 = arith.cmpi sgt, %46, %c12_i32_18 : i32
    %48 = arith.extui %47 : i1 to i32
    %c0_i32_19 = arith.constant 0 : i32
    %49 = arith.cmpi ne, %48, %c0_i32_19 : i32
    scf.if %49 {
      %53 = tpu.iota {dimensions = array<i32: 0>} : vector<16x1xi32>
      %54 = vector.broadcast %41 : i32 to vector<16x1xi32>
      %55 = arith.addi %54, %53 : vector<16x1xi32>
      %c0_22 = arith.constant 0 : index
      %c0_23 = arith.constant 0 : index
      %56 = vector.load %arg6[%c0_22, %c0_23] : memref<16x1xf32, #tpu.memory_space<vmem>>, vector<16x1xf32>
      %c12_i32_24 = arith.constant 12 : i32
      %57 = vector.broadcast %c12_i32_24 : i32 to vector<16x1xi32>
      %58 = arith.cmpi slt, %55, %57 : vector<16x1xi32>
      %cst_25 = arith.constant 0.000000e+00 : f32
      %59 = vector.broadcast %cst_25 : f32 to vector<16x1xf32>
      %60 = arith.select %58, %38, %59 : vector<16x1xi1>, vector<16x1xf32>
      %61 = arith.addf %56, %60 : vector<16x1xf32>
      %c0_26 = arith.constant 0 : index
      %c0_27 = arith.constant 0 : index
      %62 = vector.load %arg6[%c0_26, %c0_27] : memref<16x1xf32, #tpu.memory_space<vmem>>, vector<16x1xf32>
      tpu.vector_store %arg6[%c0_26, %c0_27], %61 {strides = array<i32>} : memref<16x1xf32, #tpu.memory_space<vmem>>, vector<16x1xf32>,
    } else {
    }
    %c0_i32_20 = arith.constant 0 : i32
    %50 = arith.cmpi eq, %arg1, %c0_i32_20 : i32
    %51 = arith.extui %50 : i1 to i32
    %c0_i32_21 = arith.constant 0 : i32
    %52 = arith.cmpi ne, %51, %c0_i32_21 : i32
    scf.if %52 {
      %c0_22 = arith.constant 0 : index
      %c0_23 = arith.constant 0 : index
      %53 = vector.load %arg6[%c0_22, %c0_23] : memref<16x1xf32, #tpu.memory_space<vmem>>, vector<16x1xf32>
      %cst_24 = arith.constant dense<0.000000e+00> : vector<1xf32>
      %54 = vector.multi_reduction <add>, %53, %cst_24 [0] : vector<16x1xf32> to vector<1xf32>
      %55 = vector.shape_cast %54 : vector<1xf32> to vector<1x1xf32>
      %56 = vector.shape_cast %55 : vector<1x1xf32> to vector<1x1xf32>
      %57 = vector.broadcast %56 : vector<1x1xf32> to vector<8x128xf32>
      %c0_25 = arith.constant 0 : index
      %c0_26 = arith.constant 0 : index
      %58 = vector.load %arg5[%c0_25, %c0_26] : memref<8x128xf32, #tpu.memory_space<vmem>>, vector<8x128xf32>
      tpu.vector_store %arg5[%c0_25, %c0_26], %57 {strides = array<i32>} : memref<8x128xf32, #tpu.memory_space<vmem>>, vector<8x128xf32>,
    } else {
    }
    return
  }
  func.func @transform_0(%arg0: i32, %arg1: i32) -> (i32, i32) {
    %c1_i32 = arith.constant 1 : i32
    %0 = arith.muli %arg0, %c1_i32 : i32
    %1 = arith.addi %0, %arg1 : i32
    %c0_i32 = arith.constant 0 : i32
    %2 = arith.minsi %1, %c0_i32 : i32
    %c0_i32_0 = arith.constant 0 : i32
    %c0_i32_1 = arith.constant 0 : i32
    return %2, %c0_i32_0 : i32, i32
  }
  func.func @transform_1(%arg0: i32, %arg1: i32) -> (i32, i32) {
    %c1_i32 = arith.constant 1 : i32
    %0 = arith.muli %arg0, %c1_i32 : i32
    %1 = arith.addi %0, %arg1 : i32
    %c0_i32 = arith.constant 0 : i32
    %2 = arith.minsi %1, %c0_i32 : i32
    %c0_i32_0 = arith.constant 0 : i32
    %c0_i32_1 = arith.constant 0 : i32
    return %2, %c0_i32_0 : i32, i32
  }
  func.func @transform_2(%arg0: i32, %arg1: i32) -> (i32, i32) {
    %c1_i32 = arith.constant 1 : i32
    %0 = arith.muli %arg0, %c1_i32 : i32
    %1 = arith.addi %0, %arg1 : i32
    %c0_i32 = arith.constant 0 : i32
    %2 = arith.minsi %1, %c0_i32 : i32
    %c0_i32_0 = arith.constant 0 : i32
    %c0_i32_1 = arith.constant 0 : i32
    return %2, %c0_i32_0 : i32, i32
  }
  func.func @transform_3(%arg0: i32, %arg1: i32) -> (i32, i32) {
    %c0_i32 = arith.constant 0 : i32
    %c0_i32_0 = arith.constant 0 : i32
    return %arg0, %c0_i32 : i32, i32
  }
}

</mosaic_0001>

<bundles_post_ra>
// kernel: tpu_custom_call.1
= control target key start
LH: loop header
LB: loop body
LE: loop exit
PB: predicated region body
PF: predicated region fallthrough
CT: control target
= control target key end

     0   :  { %8 = vsyncpa [#allocation4], 0  ;;  %s446_s0 = inlined_call_operand.hbm [shape: f32[12,128], index: 0, kind: input, shape index: {}]   ;;  %s447_s1 = inlined_call_operand.hbm [shape: f32[12,128], index: 1, kind: input, shape index: {}]   ;;  %s448_s2 = inlined_call_operand.hbm [shape: f32[12,128], index: 2, kind: input, shape index: {}]   ;;  %s449_s3 = inlined_call_operand.hbm [shape: f32[8,128], index: 3, kind: output, shape index: {}]  }
   0x1   :  { %9 = vsyncpa [#allocation7], 0 }
   0x2   :  { %10 = vsyncpa [#allocation5], 0  ;;  %s348_s12 = smov [#allocation6]   ;;  %s349_s14 = smov [#allocation3]  }
   0x3   :  { %s40_s13 = sshll.u32 %s348_s12, 4  ;;  %s22_s15 = sshll.u32 %s349_s14, 4  ;;  %s41_s13 = int_to_ptr.vmem [resolvable:$true] %s40_s13  ;;  %s376_s15 = int_to_ptr.vmem [resolvable:$true] %s22_s15 }
   0x4   :  { %s254_s18 = scalar_lea.hbm %s447_s1, 256 }
   0x5   :  { %p255_p0 = scmp.ne.s32.totalorder %s447_s1, %s254_s18  ;;  %p258_p1 = scmp.lt.u32.totalorder %s254_s18, %s447_s1 }
   0x7   :  { %p260_p2 = pnand %p258_p1, %p255_p0 }
   0x9   :  { %263 = shalt.err (!%p260_p2)
}
   0xa   :  { %s264_s23 = scalar_lea.vmem %s41_s13, 256  ;;  %p269_p4 = scmp.lt.s32.totalorder %s41_s13, %s41_s13 }
   0xb   :  { %p265_p3 = scmp.ne.s32.totalorder %s41_s13, %s264_s23  ;;  %p270_p5 = scmp.lt.s32.totalorder %s264_s23, %s264_s23 }
   0xd   :  { %p271_p6 = por %p270_p5, %p269_p4 }
   0xf   :  { %p272_p7 = pnand %p271_p6, %p265_p3 }
  0x11   :  { %275 = shalt.err (!%p272_p7)
}
  0x12   :  { %s350_s24 = smov 128   ;;  %s351_s25 = smov 8  }
  0x13   :  { %46 = dma.hbm_to_vmem [thread:$0]  %s447_s1, 256, %s41_s13, [#allocation7], %s350_s24, %s350_s24, %s351_s25  }
  0x14   :  { %s276_s30 = scalar_lea.hbm %s446_s0, 256 }
  0x15   :  { %p277_p8 = scmp.ne.s32.totalorder %s446_s0, %s276_s30  ;;  %p280_p9 = scmp.lt.u32.totalorder %s276_s30, %s446_s0 }
  0x17   :  { %p282_p10 = pnand %p280_p9, %p277_p8 }
  0x19   :  { %285 = shalt.err (!%p282_p10)
}
  0x1a   :  { %s286_s8 = scalar_lea.vmem %s376_s15, 256  ;;  %p291_p12 = scmp.lt.s32.totalorder %s376_s15, %s376_s15 }
  0x1b   :  { %p287_p11 = scmp.ne.s32.totalorder %s376_s15, %s286_s8  ;;  %p292_p13 = scmp.lt.s32.totalorder %s286_s8, %s286_s8 }
  0x1d   :  { %p293_p0 = por %p292_p13, %p291_p12 }
  0x1f   :  { %p294_p1 = pnand %p293_p0, %p287_p11 }
  0x21   :  { %297 = shalt.err (!%p294_p1)
}
  0x22   :  { %28 = dma.hbm_to_vmem [thread:$0]  %s446_s0, 256, %s376_s15, [#allocation4], %s350_s24, %s350_s24, %s351_s25  }
  0x23   :  { %s352_s10 = smov [#allocation8]   ;;  %s298_s14 = scalar_lea.hbm %s448_s2, 256 }
  0x24   :  { %s58_s11 = sshll.u32 %s352_s10, 4  ;;  %p299_p2 = scmp.ne.s32.totalorder %s448_s2, %s298_s14  ;;  %s59_s11 = int_to_ptr.vmem [resolvable:$true] %s58_s11 }
  0x25   :  { %p302_p3 = scmp.lt.u32.totalorder %s298_s14, %s448_s2 }
  0x27   :  { %p304_p4 = pnand %p302_p3, %p299_p2 }
  0x29   :  { %307 = shalt.err (!%p304_p4)
}
  0x2a   :  { %s308_s20 = scalar_lea.vmem %s59_s11, 256  ;;  %p313_p6 = scmp.lt.s32.totalorder %s59_s11, %s59_s11 }
  0x2b   :  { %p309_p5 = scmp.ne.s32.totalorder %s59_s11, %s308_s20  ;;  %p314_p7 = scmp.lt.s32.totalorder %s308_s20, %s308_s20 }
  0x2d   :  { %p315_p8 = por %p314_p7, %p313_p6 }
  0x2f   :  { %p316_p9 = pnand %p315_p8, %p309_p5 }
  0x31   :  { %319 = shalt.err (!%p316_p9)
}
  0x32   :  { %64 = dma.hbm_to_vmem [thread:$0]  %s448_s2, 256, %s59_s11, [#allocation7], %s350_s24, %s350_s24, %s351_s25  }
  0x33   :  { %342 = dma.done.wait [#allocation4], 256  }
  0x34   :  { %343 = vsyncadd [#allocation4], 4294967040 }
  0x35   :  { %344 = dma.done.wait [#allocation7], 512  }
  0x36   :  { %345 = vsyncadd [#allocation7], 4294966784  ;;  %v94_v0 = vld [vmem:[#allocation3 + $0x8] sm:$0xff]  ;;  %v93_v1 = vld [vmem:[#allocation3] sm:$0xff]  ;;  %vm90_vm0 = vcmask 7168   ;;  %v353_v16 = vmov 0.0   ;;  %v173_v32 = vlaneseq }
  0x37   :  { %v98_v2 = vld [vmem:[#allocation8 + $0x8] sm:$0xff]  ;;  %v100_v3 = vmul.f32 %v94_v0, %v94_v0  ;;  %v99_v4 = vmul.f32 %v93_v1, %v93_v1  ;;  %v97_v5 = vld [vmem:[#allocation8] sm:$0xff]  ;;  %v96_v8 = vld [vmem:[#allocation6 + $0x8] sm:$0xff]  ;;  %92 = vst.msk [vmem:[#allocation2 + $0x8] sm:$0xff] %vm90_vm0, %v353_v16  ;;  %v354_v17 = vmov 0   ;;  %s355_s2 = smov [#allocation9]  }
  0x38   :  { %v120_v6 = vmul.f32 %v98_v2, %v98_v2  ;;  %v119_v7 = vmul.f32 %v97_v5, %v97_v5  ;;  %v95_v9 = vld [vmem:[#allocation6] sm:$0xff]  ;;  %v110_v10 = vmul.f32 %v96_v8, %v96_v8  ;;  %v140_v12 = vmul.f32 %v98_v2, %v94_v0  ;;  %91 = vst.msk [vmem:[#allocation2] sm:$0xff] %vm90_vm0, %v353_v16  ;;  %s217_s21 = sshll.u32 %s355_s2, 4  ;;  %s218_s21 = int_to_ptr.vmem [resolvable:$true] %s217_s21 }
  0x39   :  { %103 = vadd.xlane.f32.xlu0 %v100_v3  ;;  %101 = vadd.xlane.f32.xlu1 %v99_v4  ;;  %v109_v11 = vmul.f32 %v95_v9, %v95_v9  ;;  %v139_v13 = vmul.f32 %v97_v5, %v93_v1  ;;  %v130_v14 = vmul.f32 %v96_v8, %v94_v0  ;;  %v174_v39 = vshrl.u32 %v173_v32, 7  ;;  %s320_s22 = scalar_lea.vmem %s218_s21, 128  ;;  %p325_p11 = scmp.lt.s32.totalorder %s218_s21, %s218_s21 }
  0x3a   :  { %v129_v15 = vmul.f32 %v95_v9, %v93_v1  ;;  %241 = vset.pattern.permute.xlu0 %v354_v17  ;;  %p321_p10 = scmp.ne.s32.totalorder %s218_s21, %s320_s22  ;;  %p326_p12 = scmp.lt.s32.totalorder %s320_s22, %s320_s22 }
  0x3b   :  { %v175_v47 = vadd.s32 8, %v174_v39 }
  0x3c   :  { %p327_p13 = por %p326_p12, %p325_p11 }
  0x3d   :  { %123 = vadd.xlane.f32.xlu0 %v120_v6  ;;  %121 = vadd.xlane.f32.xlu1 %v119_v7  ;;  %vm182_vm1 = vcmp.lt.s32.totalorder %v175_v47, 12 }
  0x3e   :  { %v180_v56 = vld [vmem:[#allocation2 + $0x8] sm:$0xff]  ;;  %p328_p0 = pnand %p327_p13, %p321_p10 }
  0x3f   :  { %v179_v57 = vld [vmem:[#allocation2] sm:$0xff] }
  0x41   :  { %113 = vadd.xlane.f32.xlu0 %v110_v10  ;;  %111 = vadd.xlane.f32.xlu1 %v109_v11 }
  0x45   :  { %143 = vadd.xlane.f32.xlu0 %v140_v12  ;;  %141 = vadd.xlane.f32.xlu1 %v139_v13 }
  0x49   :  { %133 = vadd.xlane.f32.xlu0 %v130_v14  ;;  %131 = vadd.xlane.f32.xlu1 %v129_v15 }
  0xc6   :  { %v104_v18 = vpop.xlane.xlu0 %103  ;;  %v102_v19 = vpop.xlane.xlu1 %101 }
  0xc7   :  { %v106_v20 = vmax.f32 %v104_v18, 1e-16  ;;  %v105_v21 = vmax.f32 %v102_v19, 1e-16 }
  0xc9   :  { %242 = vrsqrt.f32 %v106_v20 }
  0xca   :  { %v124_v22 = vpop.xlane.xlu0 %123  ;;  %v122_v23 = vpop.xlane.xlu1 %121  ;;  %244 = vrsqrt.f32 %v105_v21 }
  0xcb   :  { %v126_v24 = vmax.f32 %v124_v22, 1e-16  ;;  %v125_v25 = vmax.f32 %v122_v23, 1e-16 }
  0xcd   :  { %246 = vrsqrt.f32 %v126_v24 }
  0xce   :  { %248 = vrsqrt.f32 %v125_v25  ;;  %v114_v26 = vpop.xlane.xlu0 %113  ;;  %v112_v27 = vpop.xlane.xlu1 %111 }
  0xcf   :  { %v116_v28 = vmax.f32 %v114_v26, 1e-16  ;;  %v115_v29 = vmax.f32 %v112_v27, 1e-16 }
  0xd1   :  { %250 = vrsqrt.f32 %v116_v28 }
  0xd2   :  { %252 = vrsqrt.f32 %v115_v29  ;;  %v144_v31 = vpop.xlane.xlu0 %143  ;;  %v142_v34 = vpop.xlane.xlu1 %141 }
  0xd3   :  { %v243_v30 = vpop.eup %242 }
  0xd4   :  { %v245_v33 = vpop.eup %244 }
  0xd6   :  { %v134_v43 = vpop.xlane.xlu0 %133  ;;  %v132_v46 = vpop.xlane.xlu1 %131 }
  0xd7   :  { %v247_v35 = vpop.eup %246 }
  0xd8   :  { %v249_v36 = vpop.eup %248  ;;  %v146_v37 = vmul.f32 %v247_v35, %v243_v30 }
  0xd9   :  { %v145_v38 = vmul.f32 %v249_v36, %v245_v33 }
  0xda   :  { %v148_v40 = vmul.f32 %v146_v37, %v144_v31 }
  0xdb   :  { %v251_v41 = vpop.eup %250  ;;  %v147_v42 = vmul.f32 %v145_v38, %v142_v34 }
  0xdc   :  { %v253_v44 = vpop.eup %252  ;;  %v136_v45 = vmul.f32 %v251_v41, %v243_v30  ;;  %v150_v49 = vadd.f32 0.5, %v148_v40 }
  0xdd   :  { %v135_v48 = vmul.f32 %v253_v44, %v245_v33  ;;  %v149_v51 = vadd.f32 0.5, %v147_v42 }
  0xde   :  { %v138_v50 = vmul.f32 %v136_v45, %v134_v43 }
  0xdf   :  { %v137_v52 = vmul.f32 %v135_v48, %v132_v46 }
  0xe0   :  { %v152_v53 = vsub.f32 %v150_v49, %v138_v50 }
  0xe1   :  { %v151_v54 = vsub.f32 %v149_v51, %v137_v52 }
  0xe2   :  { %v154_v55 = vmax.f32 %v152_v53, 0.0 }
  0xe3   :  { %v153_v58 = vmax.f32 %v151_v54, 0.0 }
  0xe4   :  { %v184_v59 = vsel %vm182_vm1, %v154_v55, 0.0 }
  0xe5   :  { %v186_v60 = vadd.f32 %v184_v59, %v180_v56  ;;  %v185_v61 = vadd.f32 %v179_v57, %v153_v58 }
  0xe7   :  { %189 = vst.msk [vmem:[#allocation2 + $0x8] sm:$0xff] %vm90_vm0, %v186_v60  ;;  %188 = vst.msk [vmem:[#allocation2] sm:$0xff] %vm90_vm0, %v185_v61 }
  0xee   :  { %v193_v62 = vld [vmem:[#allocation2] sm:$0xff]  ;;  %v194_v63 = vld [vmem:[#allocation2 + $0x8] sm:$0xff] }
  0xef   :  { %v196_v0 = vsel %vm90_vm0, %v193_v62, 0.0  ;;  %v197_v1 = vsel %vm90_vm0, %v194_v63, 0.0 }
  0xf0   :  { %v198_v2 = vadd.f32 %v197_v1, %v196_v0 }
  0xf2   :  { %v199_v3 = vrot.slane %v198_v2, 4 }
  0xf4   :  { %v200_v4 = vadd.f32 %v199_v3, %v198_v2 }
  0xf6   :  { %v201_v5 = vrot.slane %v200_v4, 2 }
  0xf8   :  { %v202_v6 = vadd.f32 %v201_v5, %v200_v4 }
  0xfa   :  { %v203_v7 = vrot.slane %v202_v6, 1 }
  0xfc   :  { %v204_v8 = vadd.f32 %v203_v7, %v202_v6 }
  0xfe   :  { %207 = vperm.xlu0 %241, %v204_v8  }
 0x17d   :  { %v208_v9 = vpop.permute.xlu0 %207 }
 0x17e   :  { %210 = vst [vmem:[#allocation9] sm:$0xff] %v208_v9 }
 0x17f   :  { %331 = shalt.err (!%p328_p0)
}
 0x180   :  { %s332_s25 = scalar_lea.hbm %s449_s3, 128 }
 0x181   :  { %p333_p1 = scmp.ne.s32.totalorder %s449_s3, %s332_s25  ;;  %p336_p2 = scmp.lt.u32.totalorder %s332_s25, %s449_s3 }
 0x183   :  { %p338_p3 = pnand %p336_p2, %p333_p1 }
 0x185   :  { %341 = shalt.err (!%p338_p3)
}
 0x186   :  { %220 = dma.vmem_to_hbm [thread:$0]  %s218_s21, 128, %s449_s3, [#allocation5]  }
 0x187   :  { %346 = dma.done.wait [#allocation5], 128  }
 0x188   :  { %347 = vsyncadd [#allocation5], 4294967168 }
 0x189   :  { %224 = vsyncpa [#allocation4], 1 }
 0x18a   :  { %225 = vsyncpa [#allocation7], 1 }
 0x18b   :  { %226 = vsyncpa [#allocation5], 1 }

</bundles_post_ra>
